<compile_context>
chip_gen: v5e
topology: v5e:2x2
jax: 0.10.0
libtpu: 0.0.40
codegen_flags: <defaults>
</compile_context>

<pallas_src>
import jax
import jax.numpy as jnp
from jax.experimental import pallas as pl
from jax.experimental.pallas import tpu as pltpu


def _feature_plane_dma_kernel(feat_hbm, out_hbm, sem):
    # Pure HBM->HBM copy of the whole feature plane: no VMEM staging, no
    # compute body, no vld/vst slot usage. A single contiguous DMA saturates
    # HBM bandwidth for this copy on v5e/v6e/v7x alike.
    cp = pltpu.make_async_copy(feat_hbm, out_hbm, sem)
    cp.start()
    cp.wait()


def feature_plane_forward(features: jax.Array, *, force_pallas: bool = False) -> jax.Array:
    """Pallas equivalent of FeaturePlane.forward().

    features: (1, C, H, W) parameter array (NCHW).
    returns:  (1, C, H, W) array identical to `features`.

    By default this is a no-op (returns the parameter, exactly like the
    PyTorch module). Set `force_pallas=True` to materialize an explicit copy
    through the Pallas DMA kernel.
    """
    if not force_pallas:
        # Top optimization from the review: forward() is an identity over a
        # parameter; do not materialize any copy at all.
        return features

    return pl.pallas_call(
        _feature_plane_dma_kernel,
        out_shape=jax.ShapeDtypeStruct(features.shape, features.dtype),
        in_specs=[pl.BlockSpec(memory_space=pl.ANY)],   # raw HBM ref, no auto-DMA
        out_specs=pl.BlockSpec(memory_space=pl.ANY),    # raw HBM ref, no auto-DMA
        scratch_shapes=[pltpu.SemaphoreType.DMA],
    )(features)


if __name__ == "__main__":
    # Small shapes consistent with the module: (1, hidden_dim, res, res).
    hidden_dim = 32
    resolution = 64

    key = jax.random.PRNGKey(0)
    # Deterministic stand-in for torch.randn(1, hidden_dim, res, res).
    features = jax.random.normal(
        key, (1, hidden_dim, resolution, resolution), dtype=jnp.float32
    )

    # Fast path: identity, zero data movement (matches PyTorch semantics).
    out_fast = feature_plane_forward(features)
    assert out_fast is features

    # Pallas path: explicit HBM->HBM DMA copy, exercised once.
    out = feature_plane_forward(features, force_pallas=True)
    out = jax.block_until_ready(out)

    assert out.shape == (1, hidden_dim, resolution, resolution)
    assert out.dtype == jnp.float32
    assert bool(jnp.array_equal(out, features)), "FeaturePlane output mismatch"

    print("KERNEL_OK")
</pallas_src>

<mosaic_0001>
module attributes {stable_mosaic.version = 11 : i64} {
  func.func @_feature_plane_dma_kernel(%arg0: memref<1x32x64x64xf32, #tpu.memory_space<any>>, %arg1: memref<1x32x64x64xf32, #tpu.memory_space<any>>, %arg2: memref<!tpu.dma_semaphore, #tpu.memory_space<semaphore_mem>>) attributes {dimension_semantics = [], scalar_prefetch = 0 : i64, scratch_operands = 1 : i64, tpu.core_type = #tpu.core_type<tc>} {
    tpu.enqueue_dma source(%arg0 : memref<1x32x64x64xf32, #tpu.memory_space<any>>) target(%arg1 : memref<1x32x64x64xf32, #tpu.memory_space<any>>) target_semaphore(%arg2 : memref<!tpu.dma_semaphore, #tpu.memory_space<semaphore_mem>>)
    tpu.wait_dma2 semaphore(%arg2 : memref<!tpu.dma_semaphore, #tpu.memory_space<semaphore_mem>>) src(%arg0 : memref<1x32x64x64xf32, #tpu.memory_space<any>>) dst(%arg1 : memref<1x32x64x64xf32, #tpu.memory_space<any>>)
    return
  }
}

</mosaic_0001>

<bundles_post_ra>
// kernel: tpu_custom_call.1
= control target key start
LH: loop header
LB: loop body
LE: loop exit
PB: predicated region body
PF: predicated region fallthrough
CT: control target
= control target key end

     0   :  { %s34_s12 = smov [#allocation2]   ;;  %s35_s13 = smov [#allocation3]   ;;  %s53_s0 = inlined_call_operand.hbm [shape: f32[1,32,64,64], index: 0, kind: input, shape index: {}]   ;;  %s54_s1 = inlined_call_operand.hbm [shape: f32[1,32,64,64], index: 1, kind: output, shape index: {}]  }
   0x1   :  { %s10_s8 = sshll.u32 %s53_s0, 4  ;;  %s12_s11 = sshll.u32 %s54_s1, 4  ;;  %s11_s8 = int_to_ptr.hbm [resolvable:$true] %s10_s8  ;;  %s13_s11 = int_to_ptr.hbm [resolvable:$true] %s12_s11 }
   0x2   :  { %s36_s14 = smov 0  }
   0x3   :  { %16 = dma.general %s11_s8, 32768, %s13_s11, %s34_s12, %s35_s13, [#allocation4], %s36_s14, 0  }
   0x4   :  { %32 = dma.done.wait [#allocation2], 32768 }
   0x5   :  { %33 = vsyncadd [#allocation2], 4294934528 }
   0x6   :  { %22 = vsyncmov [#allocation2] }
   0x9   :  { %s23_s15 = vpop.sfrf %22 }
   0xa   :  { %p28_p0 = scmp.ne.s32.totalorder %s23_s15, 0 }
   0xc   :  { %27 = shalt.err (%p28_p0)  }

</bundles_post_ra>
